<compile_context>
chip_gen: v7x
topology: tpu7x:2x2x1
jax: 0.10.0
libtpu: 0.0.40
codegen_flags: <defaults>
</compile_context>

<pallas_src>
import functools

import jax
import jax.numpy as jnp
from jax.experimental import pallas as pl
from jax.experimental.pallas import tpu as pltpu

BN_EPS = 1e-5


def _block_kernel(x_ref, wmask_ref, b1_ref, wp_ref, b2_ref, out_ref, *, W, HW):
    """One sublane-merged group of images per grid step.

    x_ref    : (1, Cm, HW)   Cm = images_per_group * C; spatial flattened on lanes
    wmask_ref: (9, Cm, HW)   depthwise weight * BN1 scale * halo mask, per tap
    b1_ref   : (Cm, 1)       folded BN1 bias
    wp_ref   : (Com, Cm)     block-diagonal pointwise weight * BN2 scale
    b2_ref   : (Com, 1)      folded BN2 bias
    out_ref  : (1, Com, HW)
    """
    x = x_ref[0].astype(jnp.float32)                      # (Cm, HW)

    # ---- depthwise 3x3 (stride=1, pad=1): 9 rolled taps, one FMA each ------
    # Mask + BN1 scale + per-channel weight are pre-folded into wmask.
    acc = jnp.zeros_like(x)
    for kh in range(3):
        for kw in range(3):
            s = (kh - 1) * W + (kw - 1)                   # flat spatial offset
            t = kh * 3 + kw
            # shifted[p] == x[p + s]; wrapped values hit a folded zero weight.
            shifted = x if s == 0 else pltpu.roll(x, shift=(-s) % HW, axis=1)
            acc = acc + shifted * wmask_ref[t]            # (Cm, HW) FMA
    # BN1 bias + ReLU (scale already folded into wmask)
    h1 = jnp.maximum(acc + b1_ref[...], 0.0)              # (Cm, HW)

    # ---- pointwise 1x1 on the MXU (block-diagonal over merged images) ------
    out = jnp.dot(wp_ref[...], h1,
                  preferred_element_type=jnp.float32,
                  precision=jax.lax.Precision.HIGHEST)    # (Com, HW)
    # BN2 bias + ReLU (scale already folded into wp)
    out_ref[0] = jnp.maximum(out + b2_ref[...], 0.0).astype(out_ref.dtype)


def mobilenet_block(x_nchw, w_dw, bn1, w_pw, bn2):
    """Forward pass of Block (stride=1, is_structured=False).

    x_nchw: (N, C, H, W) float32
    w_dw:   (C, 1, 3, 3)      depthwise conv weight (PyTorch layout)
    bn1:    (gamma, beta, mean, var) each (C,)
    w_pw:   (Cout, C, 1, 1)   pointwise conv weight (PyTorch layout)
    bn2:    (gamma, beta, mean, var) each (Cout,)
    returns (N, Cout, H, W)
    """
    N, C, H, W = x_nchw.shape
    Cout = w_pw.shape[0]
    HW = H * W

    # ---- group images so each grid step fills the 8 sublanes ---------------
    ipg = min(N, max(1, 8 // C))        # images per group
    if N % ipg:
        ipg = 1
    G = N // ipg
    Cm = ipg * C                        # merged depthwise channel rows
    Com = ipg * Cout                    # merged pointwise output rows

    x_flat = x_nchw.reshape(G, Cm, HW)                    # free reshape

    # ---- fold BN into per-channel (scale, bias) and into the conv weights --
    def fold(gamma, beta, mean, var):
        scale = gamma / jnp.sqrt(var + BN_EPS)
        return scale, beta - mean * scale

    s1, b1 = fold(*bn1)
    s2, b2 = fold(*bn2)

    wdw = w_dw[:, 0, :, :].reshape(C, 9) * s1[:, None]    # (C, 9)
    wdw_m = jnp.tile(wdw, (ipg, 1))                       # (Cm, 9)

    # Per-tap 0/1 halo validity masks for pad=1, flattened to (9, HW).
    hh = jnp.arange(H)
    ww = jnp.arange(W)
    mask_rows = []
    for kh in range(3):
        for kw in range(3):
            dh, dw = kh - 1, kw - 1
            row_ok = (hh + dh >= 0) & (hh + dh < H)       # (H,)
            col_ok = (ww + dw >= 0) & (ww + dw < W)       # (W,)
            mask_rows.append((row_ok[:, None] & col_ok[None, :]).reshape(HW))
    tap_mask = jnp.stack(mask_rows, axis=0).astype(jnp.float32)    # (9, HW)

    # Fold halo mask + depthwise weight + BN1 scale into one tensor.
    wmask = tap_mask[:, None, :] * wdw_m.T[:, :, None]    # (9, Cm, HW)

    b1m = jnp.tile(b1, ipg)[:, None]                      # (Cm, 1)

    wp = w_pw[:, :, 0, 0] * s2[:, None]                   # (Cout, C)
    wp_blk = jnp.kron(jnp.eye(ipg, dtype=wp.dtype), wp)   # (Com, Cm) block-diag
    b2m = jnp.tile(b2, ipg)[:, None]                      # (Com, 1)

    kernel = functools.partial(_block_kernel, W=W, HW=HW)

    out_flat = pl.pallas_call(
        kernel,
        out_shape=jax.ShapeDtypeStruct((G, Com, HW), jnp.float32),
        grid_spec=pltpu.PrefetchScalarGridSpec(
            num_scalar_prefetch=0,
            grid=(G,),
            in_specs=[
                pl.BlockSpec((1, Cm, HW), lambda g: (g, 0, 0)),
                pl.BlockSpec((9, Cm, HW), lambda g: (0, 0, 0)),
                pl.BlockSpec((Cm, 1), lambda g: (0, 0)),
                pl.BlockSpec((Com, Cm), lambda g: (0, 0)),
                pl.BlockSpec((Com, 1), lambda g: (0, 0)),
            ],
            out_specs=pl.BlockSpec((1, Com, HW), lambda g: (g, 0, 0)),
        ),
        compiler_params=pltpu.CompilerParams(
            dimension_semantics=("parallel",)),
    )(x_flat, wmask, b1m, wp_blk, b2m)

    return out_flat.reshape(N, Cout, H, W)                # free reshape


def _reference(x_nchw, w_dw, bn1, w_pw, bn2):
    """Pure-JAX reference mirroring the PyTorch forward (inference BN)."""
    C = x_nchw.shape[1]

    def bn_relu(y, gamma, beta, mean, var):
        scale = (gamma / jnp.sqrt(var + BN_EPS))[None, :, None, None]
        bias = (beta - mean * gamma / jnp.sqrt(var + BN_EPS))[None, :, None, None]
        return jnp.maximum(y * scale + bias, 0.0)

    dw = jax.lax.conv_general_dilated(
        x_nchw, w_dw, window_strides=(1, 1), padding=((1, 1), (1, 1)),
        feature_group_count=C,
        dimension_numbers=("NCHW", "OIHW", "NCHW"))
    h = bn_relu(dw, *bn1)
    pw = jax.lax.conv_general_dilated(
        h, w_pw, window_strides=(1, 1), padding=((0, 0), (0, 0)),
        dimension_numbers=("NCHW", "OIHW", "NCHW"))
    return bn_relu(pw, *bn2)


if __name__ == "__main__":
    N, C_in, C_out, H, W = 2, 4, 8, 16, 16

    key = jax.random.PRNGKey(0)
    k = jax.random.split(key, 10)

    x = jax.random.normal(k[0], (N, C_in, H, W), jnp.float32)

    # Deterministic parameter init (shapes from Block.__init__, stride=1,
    # is_structured=False).
    w_dw = jax.random.normal(k[1], (C_in, 1, 3, 3), jnp.float32) * 0.3
    w_pw = jax.random.normal(k[2], (C_out, C_in, 1, 1), jnp.float32) * 0.3
    bn1 = (jax.random.normal(k[3], (C_in,)) * 0.1 + 1.0,           # gamma
           jax.random.normal(k[4], (C_in,)) * 0.1,                 # beta
           jax.random.normal(k[5], (C_in,)) * 0.1,                 # running_mean
           jnp.abs(jax.random.normal(k[6], (C_in,))) * 0.1 + 0.9)  # running_var
    bn2 = (jax.random.normal(k[7], (C_out,)) * 0.1 + 1.0,
           jax.random.normal(k[8], (C_out,)) * 0.1,
           jax.random.normal(k[9], (C_out,)) * 0.1,
           jnp.abs(jax.random.normal(k[0], (C_out,))) * 0.1 + 0.9)

    out = mobilenet_block(x, w_dw, bn1, w_pw, bn2)
    out = jax.block_until_ready(out)

    ref = jax.block_until_ready(_reference(x, w_dw, bn1, w_pw, bn2))
    assert out.shape == (N, C_out, H, W), out.shape
    assert jnp.allclose(out, ref, atol=1e-4, rtol=1e-4), (
        float(jnp.max(jnp.abs(out - ref))))

    print("KERNEL_OK")
</pallas_src>

<mosaic_0001>
module attributes {stable_mosaic.version = 11 : i64} {
  func.func @_block_kernel(%arg0: i32, %arg1: memref<1x8x256xf32, #tpu.memory_space<vmem>>, %arg2: memref<9x8x256xf32, #tpu.memory_space<vmem>>, %arg3: memref<8x1xf32, #tpu.memory_space<vmem>>, %arg4: memref<16x8xf32, #tpu.memory_space<vmem>>, %arg5: memref<16x1xf32, #tpu.memory_space<vmem>>, %arg6: memref<1x16x256xf32, #tpu.memory_space<vmem>>) attributes {dimension_semantics = [#tpu.dimension_semantics<parallel>], iteration_bounds = array<i64: 1>, scalar_prefetch = 0 : i64, scratch_operands = 0 : i64, tpu.core_type = #tpu.core_type<tc>, window_params = [{transform_indices = @transform_0, window_bounds = array<i64: 1, 8, 256>}, {pipeline_mode = #tpu.pipeline_mode<synchronous>, transform_indices = @transform_1, window_bounds = array<i64: 9, 8, 256>}, {pipeline_mode = #tpu.pipeline_mode<synchronous>, transform_indices = @transform_2, window_bounds = array<i64: 8, 1>}, {pipeline_mode = #tpu.pipeline_mode<synchronous>, transform_indices = @transform_3, window_bounds = array<i64: 16, 8>}, {pipeline_mode = #tpu.pipeline_mode<synchronous>, transform_indices = @transform_4, window_bounds = array<i64: 16, 1>}, {transform_indices = @transform_5, window_bounds = array<i64: 1, 16, 256>}]} {
    %c0 = arith.constant 0 : index
    %c0_0 = arith.constant 0 : index
    %c0_1 = arith.constant 0 : index
    %0 = vector.load %arg1[%c0, %c0_0, %c0_1] : memref<1x8x256xf32, #tpu.memory_space<vmem>>, vector<1x8x256xf32>
    %1 = vector.shape_cast %0 : vector<1x8x256xf32> to vector<8x256xf32>
    %cst = arith.constant 0.000000e+00 : f32
    %2 = vector.broadcast %cst : f32 to vector<8x256xf32>
    %c17_i32 = arith.constant 17 : i32
    %3 = tpu.dynamic_rotate %1 by %c17_i32 dim 1 : vector<8x256xf32>, i32 -> vector<8x256xf32>
    %c0_2 = arith.constant 0 : index
    %c0_3 = arith.constant 0 : index
    %c0_4 = arith.constant 0 : index
    %4 = vector.load %arg2[%c0_2, %c0_3, %c0_4] : memref<9x8x256xf32, #tpu.memory_space<vmem>>, vector<1x8x256xf32>
    %5 = vector.shape_cast %4 : vector<1x8x256xf32> to vector<8x256xf32>
    %6 = arith.mulf %3, %5 : vector<8x256xf32>
    %7 = arith.addf %2, %6 : vector<8x256xf32>
    %c16_i32 = arith.constant 16 : i32
    %8 = tpu.dynamic_rotate %1 by %c16_i32 dim 1 : vector<8x256xf32>, i32 -> vector<8x256xf32>
    %c1 = arith.constant 1 : index
    %c0_5 = arith.constant 0 : index
    %c0_6 = arith.constant 0 : index
    %9 = vector.load %arg2[%c1, %c0_5, %c0_6] : memref<9x8x256xf32, #tpu.memory_space<vmem>>, vector<1x8x256xf32>
    %10 = vector.shape_cast %9 : vector<1x8x256xf32> to vector<8x256xf32>
    %11 = arith.mulf %8, %10 : vector<8x256xf32>
    %12 = arith.addf %7, %11 : vector<8x256xf32>
    %c15_i32 = arith.constant 15 : i32
    %13 = tpu.dynamic_rotate %1 by %c15_i32 dim 1 : vector<8x256xf32>, i32 -> vector<8x256xf32>
    %c2 = arith.constant 2 : index
    %c0_7 = arith.constant 0 : index
    %c0_8 = arith.constant 0 : index
    %14 = vector.load %arg2[%c2, %c0_7, %c0_8] : memref<9x8x256xf32, #tpu.memory_space<vmem>>, vector<1x8x256xf32>
    %15 = vector.shape_cast %14 : vector<1x8x256xf32> to vector<8x256xf32>
    %16 = arith.mulf %13, %15 : vector<8x256xf32>
    %17 = arith.addf %12, %16 : vector<8x256xf32>
    %c1_i32 = arith.constant 1 : i32
    %18 = tpu.dynamic_rotate %1 by %c1_i32 dim 1 : vector<8x256xf32>, i32 -> vector<8x256xf32>
    %c3 = arith.constant 3 : index
    %c0_9 = arith.constant 0 : index
    %c0_10 = arith.constant 0 : index
    %19 = vector.load %arg2[%c3, %c0_9, %c0_10] : memref<9x8x256xf32, #tpu.memory_space<vmem>>, vector<1x8x256xf32>
    %20 = vector.shape_cast %19 : vector<1x8x256xf32> to vector<8x256xf32>
    %21 = arith.mulf %18, %20 : vector<8x256xf32>
    %22 = arith.addf %17, %21 : vector<8x256xf32>
    %c4 = arith.constant 4 : index
    %c0_11 = arith.constant 0 : index
    %c0_12 = arith.constant 0 : index
    %23 = vector.load %arg2[%c4, %c0_11, %c0_12] : memref<9x8x256xf32, #tpu.memory_space<vmem>>, vector<1x8x256xf32>
    %24 = vector.shape_cast %23 : vector<1x8x256xf32> to vector<8x256xf32>
    %25 = arith.mulf %1, %24 : vector<8x256xf32>
    %26 = arith.addf %22, %25 : vector<8x256xf32>
    %c255_i32 = arith.constant 255 : i32
    %27 = tpu.dynamic_rotate %1 by %c255_i32 dim 1 : vector<8x256xf32>, i32 -> vector<8x256xf32>
    %c5 = arith.constant 5 : index
    %c0_13 = arith.constant 0 : index
    %c0_14 = arith.constant 0 : index
    %28 = vector.load %arg2[%c5, %c0_13, %c0_14] : memref<9x8x256xf32, #tpu.memory_space<vmem>>, vector<1x8x256xf32>
    %29 = vector.shape_cast %28 : vector<1x8x256xf32> to vector<8x256xf32>
    %30 = arith.mulf %27, %29 : vector<8x256xf32>
    %31 = arith.addf %26, %30 : vector<8x256xf32>
    %c241_i32 = arith.constant 241 : i32
    %32 = tpu.dynamic_rotate %1 by %c241_i32 dim 1 : vector<8x256xf32>, i32 -> vector<8x256xf32>
    %c6 = arith.constant 6 : index
    %c0_15 = arith.constant 0 : index
    %c0_16 = arith.constant 0 : index
    %33 = vector.load %arg2[%c6, %c0_15, %c0_16] : memref<9x8x256xf32, #tpu.memory_space<vmem>>, vector<1x8x256xf32>
    %34 = vector.shape_cast %33 : vector<1x8x256xf32> to vector<8x256xf32>
    %35 = arith.mulf %32, %34 : vector<8x256xf32>
    %36 = arith.addf %31, %35 : vector<8x256xf32>
    %c240_i32 = arith.constant 240 : i32
    %37 = tpu.dynamic_rotate %1 by %c240_i32 dim 1 : vector<8x256xf32>, i32 -> vector<8x256xf32>
    %c7 = arith.constant 7 : index
    %c0_17 = arith.constant 0 : index
    %c0_18 = arith.constant 0 : index
    %38 = vector.load %arg2[%c7, %c0_17, %c0_18] : memref<9x8x256xf32, #tpu.memory_space<vmem>>, vector<1x8x256xf32>
    %39 = vector.shape_cast %38 : vector<1x8x256xf32> to vector<8x256xf32>
    %40 = arith.mulf %37, %39 : vector<8x256xf32>
    %41 = arith.addf %36, %40 : vector<8x256xf32>
    %c239_i32 = arith.constant 239 : i32
    %42 = tpu.dynamic_rotate %1 by %c239_i32 dim 1 : vector<8x256xf32>, i32 -> vector<8x256xf32>
    %c8 = arith.constant 8 : index
    %c0_19 = arith.constant 0 : index
    %c0_20 = arith.constant 0 : index
    %43 = vector.load %arg2[%c8, %c0_19, %c0_20] : memref<9x8x256xf32, #tpu.memory_space<vmem>>, vector<1x8x256xf32>
    %44 = vector.shape_cast %43 : vector<1x8x256xf32> to vector<8x256xf32>
    %45 = arith.mulf %42, %44 : vector<8x256xf32>
    %46 = arith.addf %41, %45 : vector<8x256xf32>
    %c0_21 = arith.constant 0 : index
    %c0_22 = arith.constant 0 : index
    %47 = vector.load %arg3[%c0_21, %c0_22] : memref<8x1xf32, #tpu.memory_space<vmem>>, vector<8x1xf32>
    %48 = vector.broadcast %47 : vector<8x1xf32> to vector<8x256xf32>
    %49 = arith.addf %46, %48 : vector<8x256xf32>
    %cst_23 = arith.constant 0.000000e+00 : f32
    %50 = vector.broadcast %cst_23 : f32 to vector<8x256xf32>
    %51 = arith.maximumf %49, %50 : vector<8x256xf32>
    %c0_24 = arith.constant 0 : index
    %c0_25 = arith.constant 0 : index
    %52 = vector.load %arg4[%c0_24, %c0_25] : memref<16x8xf32, #tpu.memory_space<vmem>>, vector<16x8xf32>
    %cst_26 = arith.constant dense<0.000000e+00> : vector<16x256xf32>
    %53 = tpu.matmul %52, %51, %cst_26 {dimension_numbers = #tpu.dot_dimension_numbers<[1], [0], [0], [1], [0, 0, 1, 1], [], []>, precision = #tpu.contract_precision<fp32>} : vector<16x8xf32>, vector<8x256xf32>, vector<16x256xf32> -> vector<16x256xf32>
    %c0_27 = arith.constant 0 : index
    %c0_28 = arith.constant 0 : index
    %54 = vector.load %arg5[%c0_27, %c0_28] : memref<16x1xf32, #tpu.memory_space<vmem>>, vector<16x1xf32>
    %55 = vector.broadcast %54 : vector<16x1xf32> to vector<16x256xf32>
    %56 = arith.addf %53, %55 : vector<16x256xf32>
    %cst_29 = arith.constant 0.000000e+00 : f32
    %57 = vector.broadcast %cst_29 : f32 to vector<16x256xf32>
    %58 = arith.maximumf %56, %57 : vector<16x256xf32>
    %c0_30 = arith.constant 0 : index
    %c0_31 = arith.constant 0 : index
    %c0_32 = arith.constant 0 : index
    %59 = vector.load %arg6[%c0_30, %c0_31, %c0_32] : memref<1x16x256xf32, #tpu.memory_space<vmem>>, vector<1x16x256xf32>
    %60 = vector.shape_cast %59 : vector<1x16x256xf32> to vector<16x256xf32>
    %61 = vector.shape_cast %58 : vector<16x256xf32> to vector<1x16x256xf32>
    tpu.vector_store %arg6[%c0_30, %c0_31, %c0_32], %61 {strides = array<i32>} : memref<1x16x256xf32, #tpu.memory_space<vmem>>, vector<1x16x256xf32>,
    return
  }
  func.func @transform_0(%arg0: i32) -> (i32, i32, i32) {
    %c0_i32 = arith.constant 0 : i32
    %c0_i32_0 = arith.constant 0 : i32
    %c0_i32_1 = arith.constant 0 : i32
    return %arg0, %c0_i32, %c0_i32_0 : i32, i32, i32
  }
  func.func @transform_1(%arg0: i32) -> (i32, i32, i32) {
    %c0_i32 = arith.constant 0 : i32
    %c0_i32_0 = arith.constant 0 : i32
    %c0_i32_1 = arith.constant 0 : i32
    %c0_i32_2 = arith.constant 0 : i32
    return %c0_i32, %c0_i32_0, %c0_i32_1 : i32, i32, i32
  }
  func.func @transform_2(%arg0: i32) -> (i32, i32) {
    %c0_i32 = arith.constant 0 : i32
    %c0_i32_0 = arith.constant 0 : i32
    %c0_i32_1 = arith.constant 0 : i32
    return %c0_i32, %c0_i32_0 : i32, i32
  }
  func.func @transform_3(%arg0: i32) -> (i32, i32) {
    %c0_i32 = arith.constant 0 : i32
    %c0_i32_0 = arith.constant 0 : i32
    %c0_i32_1 = arith.constant 0 : i32
    return %c0_i32, %c0_i32_0 : i32, i32
  }
  func.func @transform_4(%arg0: i32) -> (i32, i32) {
    %c0_i32 = arith.constant 0 : i32
    %c0_i32_0 = arith.constant 0 : i32
    %c0_i32_1 = arith.constant 0 : i32
    return %c0_i32, %c0_i32_0 : i32, i32
  }
  func.func @transform_5(%arg0: i32) -> (i32, i32, i32) {
    %c0_i32 = arith.constant 0 : i32
    %c0_i32_0 = arith.constant 0 : i32
    %c0_i32_1 = arith.constant 0 : i32
    return %arg0, %c0_i32, %c0_i32_0 : i32, i32, i32
  }
}

</mosaic_0001>

<bundles_post_ra>
// kernel: tpu_custom_call.1
= control target key start
LH: loop header
LB: loop body
LE: loop exit
PB: predicated region body
PF: predicated region fallthrough
CT: control target
= control target key end

     0   :  { %10 = vsyncpa [#allocation3], 0  ;;  %s981_s0 = inlined_call_operand.vmem [shape: f32[1,8,256], index: 0, kind: input, shape index: {}]   ;;  %s982_s1 = inlined_call_operand.hbm [shape: f32[9,8,256], index: 1, kind: input, shape index: {}]   ;;  %s983_s2 = inlined_call_operand.vmem [shape: f32[8,1], index: 2, kind: input, shape index: {}]   ;;  %s984_s3 = inlined_call_operand.vmem [shape: f32[16,8], index: 3, kind: input, shape index: {}]   ;;  %s985_s4 = inlined_call_operand.vmem [shape: f32[16,1], index: 4, kind: input, shape index: {}]   ;;  %s986_s5 = inlined_call_operand.hbm [shape: f32[1,16,256], index: 5, kind: output, shape index: {}]  }
   0x1   :  { %11 = vsyncpa [#allocation4], 0  ;;  %s814_s18 = smov [#allocation2]   ;;  %s766_s22 = scalar_lea.hbm %s982_s1, 2304 }
   0x2   :  { %s19_s19 = sshll.u32 %s814_s18, 4  ;;  %p767_p0 = scmp.ne.s32.totalorder %s982_s1, %s766_s22  ;;  %s20_s19 = int_to_ptr.vmem [resolvable:$true] %s19_s19 }
   0x3   :  { %p770_p1 = scmp.lt.u32.totalorder %s766_s22, %s982_s1 }
   0x5   :  { %p772_p2 = pnand %p770_p1, %p767_p0 }
   0x7   :  { %775 = shalt.err (!%p772_p2)
}
   0x8   :  { %s776_s27 = scalar_lea.vmem %s20_s19, 2304  ;;  %p781_p4 = scmp.lt.s32.totalorder %s20_s19, %s20_s19 }
   0x9   :  { %p777_p3 = scmp.ne.s32.totalorder %s20_s19, %s776_s27  ;;  %p782_p5 = scmp.lt.s32.totalorder %s776_s27, %s776_s27 }
   0xb   :  { %p783_p6 = por %p782_p5, %p781_p4 }
   0xd   :  { %p784_p7 = pnand %p783_p6, %p777_p3 }
   0xf   :  { %787 = shalt.err (!%p784_p7)
}
  0x10   :  { %s815_s28 = smov 256   ;;  %s816_s29 = smov 16  }
  0x11   :  { %25 = dma.hbm_to_vmem [thread:$0]  %s982_s1, 2304, %s20_s19, [#allocation3], %s815_s28, %s815_s28, %s816_s29  }
  0x12   :  { %810 = dma.done.wait [#allocation3], 2304  }
  0x13   :  { %811 = vsyncadd [#allocation3], 4294964992  ;;  %v817_v0 = vmov 0   ;;  %v875_v1 = vld [vmem:[%s981_s0] sm:$0xff]  ;;  %s818_s9 = smov 17   ;;  %v883_v2 = vld [vmem:[%s981_s0 + $0x8] sm:$0xff]  ;;  %v41_v9 = vlaneseq }
  0x14   :  { %764 = vset.pattern.permute.xlu0 %v817_v0  ;;  %765 = vset.pattern.permute.xlu1 %v817_v0  ;;  %s819_s1 = smov 15   ;;  %s820_s12 = smov 1   ;;  %v157_v3 = vld [vmem:[%s983_s2] sm:$0xff]  ;;  %v825_v5 = vmov 0.0   ;;  %v170_v6 = vld [vmem:[%s985_s4 + $0x8] sm:$0xff]  ;;  %v60_v17 = vld [vmem:[#allocation2 + $0x10] sm:$0xff] }
  0x15   :  { %52 = vrot.lane.b32.xlu1 %v875_v1, %s816_s29  ;;  %37 = vrot.lane.b32.xlu0 %v875_v1, %s818_s9  ;;  %s821_s13 = smov 127   ;;  %s822_s0 = smov 113   ;;  %v169_v4 = vld [vmem:[%s985_s4] sm:$0xff]  ;;  %v911_v12 = vand.u32 127, %v41_v9  ;;  %v61_v18 = vld [vmem:[#allocation2 + $0x18] sm:$0xff]  ;;  %v47_v22 = vld [vmem:[#allocation2 + $0x8] sm:$0xff] }
  0x16   :  { %s823_s14 = smov 112   ;;  %s824_s17 = smov 111   ;;  %254 = vmatprep.mubr.f32.mxu1 %v825_v5  ;;  %517 = vmatprep.mubr.f32.mxu0 %v825_v5  ;;  %v46_v21 = vld [vmem:[#allocation2] sm:$0xff]  ;;  %v75_v28 = vld [vmem:[#allocation2 + $0x28] sm:$0xff]  ;;  %v88_v35 = vld [vmem:[#allocation2 + $0x30] sm:$0xff]  ;;  %vm181_vm4 = vcmask 64512  }
  0x17   :  { %vm56_vm0 = vcmp.lt.s32.totalorder %v911_v12, 16  ;;  %vm43_vm1 = vcmp.lt.s32.totalorder %v911_v12, 17  ;;  %vm70_vm2 = vcmp.lt.s32.totalorder %v911_v12, 15  ;;  %vm84_vm3 = vcmp.lt.s32.totalorder %v911_v12, 1  ;;  %v74_v27 = vld [vmem:[#allocation2 + $0x20] sm:$0xff]  ;;  %v89_v36 = vld [vmem:[#allocation2 + $0x38] sm:$0xff] }
  0x18   :  { %v95_v46 = vld [vmem:[#allocation2 + $0x40] sm:$0xff]  ;;  %v96_v47 = vld [vmem:[#allocation2 + $0x48] sm:$0xff]  ;;  %vm105_vm5 = vcmp.lt.s32.totalorder %v911_v12, 127  ;;  %vm119_vm6 = vcmp.lt.s32.totalorder %v911_v12, 113  ;;  %v109_v59 = vld [vmem:[#allocation2 + $0x50] sm:$0xff]  ;;  %vm133_vm7 = vcmp.lt.s32.totalorder %v911_v12, 112 }
  0x19   :  { %54 = vrot.lane.b32.xlu1 %v883_v2, %s816_s29  ;;  %39 = vrot.lane.b32.xlu0 %v883_v2, %s818_s9  ;;  %v167_v49 = vld [vmem:[%s984_s3] sm:$0xff]  ;;  %v98_v53 = vmul.f32 %v96_v47, %v883_v2  ;;  %v97_v54 = vmul.f32 %v95_v46, %v875_v1  ;;  %v168_v58 = vld [vmem:[%s984_s3 + $0x8] sm:$0xff]  ;;  %v110_v60 = vld [vmem:[#allocation2 + $0x58] sm:$0xff]  ;;  %vm147_vm8 = vcmp.lt.s32.totalorder %v911_v12, 111  ;;  %s826_s3 = smov [#allocation5]  }
  0x1a   :  { %v183_v57 = vsel %vm181_vm4, %v167_v49, 0  ;;  %s715_s24 = sshll.u32 %s826_s3, 4  ;;  %s716_s24 = int_to_ptr.vmem [resolvable:$true] %s715_s24 }
  0x1b   :  { %s788_s25 = scalar_lea.vmem %s716_s24, 512  ;;  %p793_p9 = scmp.lt.s32.totalorder %s716_s24, %s716_s24 }
  0x1c   :  { %p789_p8 = scmp.ne.s32.totalorder %s716_s24, %s788_s25  ;;  %p794_p10 = scmp.lt.s32.totalorder %s788_s25, %s788_s25 }
  0x1d   :  { %68 = vrot.lane.b32.xlu1 %v883_v2, %s819_s1  ;;  %66 = vrot.lane.b32.xlu0 %v875_v1, %s819_s1 }
  0x1e   :  { %p795_p11 = por %p794_p10, %p793_p9 }
  0x20   :  { %p796_p12 = pnand %p795_p11, %p789_p8 }
  0x21   :  { %82 = vrot.lane.b32.xlu1 %v883_v2, %s820_s12  ;;  %80 = vrot.lane.b32.xlu0 %v875_v1, %s820_s12 }
  0x25   :  { %103 = vrot.lane.b32.xlu1 %v883_v2, %s821_s13  ;;  %101 = vrot.lane.b32.xlu0 %v875_v1, %s821_s13 }
  0x29   :  { %117 = vrot.lane.b32.xlu1 %v883_v2, %s822_s0  ;;  %115 = vrot.lane.b32.xlu0 %v875_v1, %s822_s0 }
  0x2d   :  { %131 = vrot.lane.b32.xlu1 %v883_v2, %s823_s14  ;;  %129 = vrot.lane.b32.xlu0 %v875_v1, %s823_s14 }
  0x31   :  { %143 = vrot.lane.b32.xlu1 %v875_v1, %s824_s17  ;;  %160 = vperm.xlu0 %764, %v157_v3   ;;  %v123_v1 = vld [vmem:[#allocation2 + $0x60] sm:$0xff] }
  0x35   :  { %145 = vrot.lane.b32.xlu1 %v883_v2, %s824_s17  ;;  %173 = vperm.xlu0 %764, %v169_v4   ;;  %v124_v2 = vld [vmem:[#allocation2 + $0x68] sm:$0xff] }
  0x39   :  { %178 = vperm.xlu1 %765, %v170_v6   ;;  %v930_v6 = vand.u32 4294901760, %v183_v57 }
  0x87   :  { %v53_v7 = vpop.permute.xlu1 %52  ;;  %v38_v8 = vpop.permute.xlu0 %37 }
  0x8b   :  { %v55_v10 = vpop.permute.xlu1 %54  ;;  %v40_v11 = vpop.permute.xlu0 %39 }
  0x8c   :  { %v57_v19 = vsel %vm56_vm0, %v53_v7, %v55_v10  ;;  %v58_v20 = vsel %vm56_vm0, %v55_v10, %v53_v7  ;;  %v44_v23 = vsel %vm43_vm1, %v38_v8, %v40_v11  ;;  %v45_v24 = vsel %vm43_vm1, %v40_v11, %v38_v8 }
  0x8d   :  { %v62_v31 = vmul.f32 %v60_v17, %v58_v20  ;;  %v63_v32 = vmul.f32 %v61_v18, %v57_v19  ;;  %v48_v33 = vmul.f32 %v46_v21, %v45_v24  ;;  %v49_v34 = vmul.f32 %v47_v22, %v44_v23  ;;  %v151_v20 = vld [vmem:[#allocation2 + $0x80] sm:$0xff]  ;;  %v152_v21 = vld [vmem:[#allocation2 + $0x88] sm:$0xff] }
  0x8e   :  { %v186_v7 = vsel %vm181_vm4, %v168_v58, 0  ;;  %v942_v24 = vsub.f32 %v183_v57, %v930_v6 }
  0x8f   :  { %v69_v13 = vpop.permute.xlu1 %68  ;;  %v67_v14 = vpop.permute.xlu0 %66  ;;  %v64_v42 = vadd.f32 %v62_v31, %v48_v33  ;;  %v65_v43 = vadd.f32 %v63_v32, %v49_v34 }
  0x90   :  { %v71_v29 = vsel %vm70_vm2, %v67_v14, %v69_v13  ;;  %v72_v30 = vsel %vm70_vm2, %v69_v13, %v67_v14  ;;  %v137_v13 = vld [vmem:[#allocation2 + $0x70] sm:$0xff]  ;;  %v138_v14 = vld [vmem:[#allocation2 + $0x78] sm:$0xff] }
  0x91   :  { %v76_v39 = vmul.f32 %v74_v27, %v72_v30  ;;  %v77_v40 = vmul.f32 %v75_v28, %v71_v29 }
  0x93   :  { %v83_v15 = vpop.permute.xlu1 %82  ;;  %v81_v16 = vpop.permute.xlu0 %80  ;;  %v78_v50 = vadd.f32 %v76_v39, %v64_v42  ;;  %v79_v51 = vadd.f32 %v77_v40, %v65_v43 }
  0x94   :  { %v85_v37 = vsel %vm84_vm3, %v81_v16, %v83_v15  ;;  %v86_v38 = vsel %vm84_vm3, %v83_v15, %v81_v16 }
  0x95   :  { %v90_v44 = vmul.f32 %v88_v35, %v86_v38  ;;  %v91_v45 = vmul.f32 %v89_v36, %v85_v37  ;;  %v257_v36 = vand.u32 4294901760, %v942_v24 }
  0x97   :  { %v104_v25 = vpop.permute.xlu1 %103  ;;  %v102_v26 = vpop.permute.xlu0 %101  ;;  %v92_v55 = vadd.f32 %v90_v44, %v78_v50  ;;  %v93_v56 = vadd.f32 %v91_v45, %v79_v51  ;;  %v258_v42 = vsub.f32 %v942_v24, %v257_v36 }
  0x98   :  { %v106_v61 = vsel %vm105_vm5, %v102_v26, %v104_v25  ;;  %v107_v62 = vsel %vm105_vm5, %v104_v25, %v102_v26  ;;  %v944_v25 = vand.u32 4294901760, %v186_v7 }
  0x99   :  { %v100_v8 = vadd.f32 %v98_v53, %v93_v56  ;;  %v99_v9 = vadd.f32 %v97_v54, %v92_v55  ;;  %v111_v10 = vmul.f32 %v109_v59, %v106_v61  ;;  %v112_v11 = vmul.f32 %v110_v60, %v107_v62 }
  0x9a   :  { %v267_v12 = vsub.f32 %v186_v7, %v944_v25 }
  0x9b   :  { %v118_v41 = vpop.permute.xlu1 %117  ;;  %v116_v48 = vpop.permute.xlu0 %115  ;;  %v113_v26 = vadd.f32 %v111_v10, %v99_v9  ;;  %v114_v27 = vadd.f32 %v112_v11, %v100_v8 }
  0x9c   :  { %v120_v3 = vsel %vm119_vm6, %v116_v48, %v118_v41  ;;  %v121_v4 = vsel %vm119_vm6, %v118_v41, %v116_v48  ;;  %v268_v43 = vand.u32 4294901760, %v267_v12  ;;  %v259_v48 = vand.u32 4294901760, %v258_v42 }
  0x9d   :  { %v125_v17 = vmul.f32 %v123_v1, %v120_v3  ;;  %v126_v18 = vmul.f32 %v124_v2, %v121_v4 }
  0x9e   :  { %v269_v49 = vsub.f32 %v267_v12, %v268_v43 }
  0x9f   :  { %v132_v52 = vpop.permute.xlu1 %131  ;;  %v130_v63 = vpop.permute.xlu0 %129  ;;  %v127_v30 = vadd.f32 %v125_v17, %v113_v26  ;;  %v128_v31 = vadd.f32 %v126_v18, %v114_v27 }
  0xa0   :  { %v134_v15 = vsel %vm133_vm7, %v130_v63, %v132_v52  ;;  %v135_v16 = vsel %vm133_vm7, %v132_v52, %v130_v63  ;;  %v270_v54 = vand.u32 4294901760, %v269_v49 }
  0xa1   :  { %v139_v28 = vmul.f32 %v137_v13, %v134_v15  ;;  %v140_v29 = vmul.f32 %v138_v14, %v135_v16 }
  0xa3   :  { %v144_v0 = vpop.permute.xlu1 %143  ;;  %v141_v34 = vadd.f32 %v139_v28, %v127_v30  ;;  %v142_v35 = vadd.f32 %v140_v29, %v128_v31 }
  0xa7   :  { %v146_v19 = vpop.permute.xlu1 %145 }
  0xa8   :  { %v148_v22 = vsel %vm147_vm8, %v144_v0, %v146_v19  ;;  %v149_v23 = vsel %vm147_vm8, %v146_v19, %v144_v0 }
  0xa9   :  { %v153_v32 = vmul.f32 %v151_v20, %v148_v22  ;;  %v154_v33 = vmul.f32 %v152_v21, %v149_v23 }
  0xab   :  { %v156_v37 = vadd.f32 %v154_v33, %v142_v35  ;;  %v155_v38 = vadd.f32 %v153_v32, %v141_v34 }
  0xb0   :  { %v161_v39 = vpop.permute.xlu0 %160 }
  0xb1   :  { %v163_v40 = vadd.f32 %v161_v39, %v155_v38  ;;  %v164_v41 = vadd.f32 %v161_v39, %v156_v37 }
  0xb3   :  { %v165_v44 = vmax.f32 %v163_v40, 0.0  ;;  %v166_v45 = vmax.f32 %v164_v41, 0.0 }
  0xb4   :  { %v174_v59 = vpop.permute.xlu0 %173 }
  0xb5   :  { %v188_v46 = vand.u32 4294901760, %v166_v45  ;;  %v190_v47 = vand.u32 4294901760, %v165_v44 }
  0xb7   :  { %v278_v50 = vsub.f32 %v166_v45, %v188_v46  ;;  %v284_v51 = vsub.f32 %v165_v44, %v190_v47  ;;  %189 = vmatprep.subr.mxu1 %v188_v46  ;;  %452 = vmatprep.subr.mxu0 %v188_v46 }
  0xb8   :  { %191 = vmatpush1.msra.mxu1 %v190_v47  ;;  %454 = vmatpush1.msra.mxu0 %v190_v47  ;;  %v179_v2 = vpop.permute.xlu1 %178 }
  0xb9   :  { %260 = vmatmul.mubr.f32.vlgmr.msra.gmra.mrb[0].mxu1 %v259_v48  ;;  %521 = vmatmul.mubr.f32.vlgmr.msra.gmra.mrb[0].mxu0 %v257_v36  ;;  %v279_v52 = vand.u32 4294901760, %v278_v50  ;;  %v285_v53 = vand.u32 4294901760, %v284_v51 }
  0xba   :  { %265 = vmatprep.mubr.f32.mxu1 %v825_v5  ;;  %526 = vmatprep.mubr.f32.mxu0 %v825_v5 }
  0xbb   :  { %539 = vmatprep.subr.mxu0 %v279_v52  ;;  %v280_v55 = vsub.f32 %v278_v50, %v279_v52  ;;  %v286_v56 = vsub.f32 %v284_v51, %v285_v53 }
  0xbc   :  { %543 = vmatpush1.msra.mxu0 %v285_v53 }
  0xbd   :  { %271 = vmatmul.mubr.f32.gmra.mrb[2].mxu1 %v270_v54  ;;  %530 = vmatmul.mubr.f32.gmra.mrb[2].mxu0 %v268_v43  ;;  %v281_v57 = vand.u32 4294901760, %v280_v55  ;;  %v287_v58 = vand.u32 4294901760, %v286_v56 }
  0xbe   :  { %622 = vmatprep.subr.mxu0 %v188_v46  ;;  %351 = vmatprep.mubr.f32.mxu1 %v825_v5 }
  0xbf   :  { %282 = vmatprep.subr.mxu1 %v281_v57  ;;  %606 = vmatprep.mubr.f32.mxu0 %v825_v5 }
  0xc0   :  { %288 = vmatpush1.msra.mxu1 %v287_v58 }
  0xc1   :  { %353 = vmatmul.mubr.f32.vlgmr.msra.gmra.mrb[0].mxu1 %v930_v6  ;;  %368 = vmatprep.subr.mxu1 %v278_v50 }
  0xc2   :  { %608 = vmatmul.mubr.f32.vlgmr.msra.gmra.mrb[0].mxu0 %v930_v6  ;;  %371 = vmatpush1.msra.mxu1 %v284_v51 }
  0xc3   :  { %624 = vmatpush1.msra.mxu0 %v190_v47  ;;  %358 = vmatprep.mubr.f32.mxu1 %v825_v5 }
  0xc4   :  { %613 = vmatprep.mubr.f32.mxu0 %v825_v5 }
  0xc5   :  { %360 = vmatmul.mubr.f32.gmra.mrb[2].mxu1 %v944_v25 }
  0xc6   :  { %615 = vmatmul.mubr.f32.gmra.mrb[2].mxu0 %v944_v25  ;;  %434 = vmatprep.mubr.f32.mxu1 %v825_v5 }
  0xc7   :  { %687 = vmatprep.mubr.f32.mxu0 %v825_v5 }
  0xc9   :  { %437 = vmatmul.mubr.f32.vlgmr.msra.gmra.mrb[0].mxu1 %v942_v24 }
  0xca   :  { %689 = vmatmul.mubr.f32.vlgmr.msra.gmra.mrb[0].mxu0 %v930_v6  ;;  %442 = vmatprep.mubr.f32.mxu1 %v825_v5 }
  0xcb   :  { %694 = vmatprep.mubr.f32.mxu0 %v825_v5 }
  0xcd   :  { %445 = vmatmul.mubr.f32.gmra.mrb[2].mxu1 %v267_v12 }
  0xce   :  { %696 = vmatmul.mubr.f32.gmra.mrb[2].mxu0 %v944_v25 }
 0x19c   :  { %v438_v60 = vpop.f32.mrb[0].mxu1 }
 0x19d   :  { %v727_v61 = vadd.f32 %v438_v60, %v174_v59  ;;  %v690_v62 = vpop.f32.mrb[0].mxu0  ;;  %v440_v63 = vpop.f32.mrb[1].mxu1 }
 0x19e   :  { %v729_v0 = vadd.f32 %v440_v63, %v174_v59  ;;  %v692_v1 = vpop.f32.mrb[1].mxu0 }
 0x19f   :  { %v728_v3 = vadd.f32 %v727_v61, %v690_v62 }
 0x1a0   :  { %v730_v4 = vadd.f32 %v729_v0, %v692_v1  ;;  %v446_v7 = vpop.f32.mrb[2].mxu1 }
 0x1a1   :  { %v702_v8 = vmax.f32 %v728_v3, 0.0  ;;  %v731_v6 = vadd.f32 %v446_v7, %v179_v2  ;;  %v697_v9 = vpop.f32.mrb[2].mxu0  ;;  %v448_v10 = vpop.f32.mrb[3].mxu1 }
 0x1a2   :  { %v703_v11 = vmax.f32 %v730_v4, 0.0  ;;  %v733_v5 = vadd.f32 %v448_v10, %v179_v2  ;;  %v699_v13 = vpop.f32.mrb[3].mxu0 }
 0x1a3   :  { %706 = vst [vmem:[#allocation5] sm:$0xff] %v702_v8  ;;  %v732_v14 = vadd.f32 %v731_v6, %v697_v9 }
 0x1a4   :  { %707 = vst [vmem:[#allocation5 + $0x8] sm:$0xff] %v703_v11  ;;  %v734_v15 = vadd.f32 %v733_v5, %v699_v13 }
 0x1a5   :  { %v704_v16 = vmax.f32 %v732_v14, 0.0 }
 0x1a6   :  { %v705_v17 = vmax.f32 %v734_v15, 0.0 }
 0x1a7   :  { %708 = vst [vmem:[#allocation5 + $0x10] sm:$0xff] %v704_v16 }
 0x1a8   :  { %709 = vst [vmem:[#allocation5 + $0x18] sm:$0xff] %v705_v17 }
 0x1a9   :  { %799 = shalt.err (!%p796_p12)
}
 0x1aa   :  { %s800_s30 = scalar_lea.hbm %s986_s5, 512 }
 0x1ab   :  { %p801_p13 = scmp.ne.s32.totalorder %s986_s5, %s800_s30  ;;  %p804_p0 = scmp.lt.u32.totalorder %s800_s30, %s986_s5 }
 0x1ad   :  { %p806_p1 = pnand %p804_p0, %p801_p13 }
 0x1af   :  { %809 = shalt.err (!%p806_p1)
}
 0x1b0   :  { %721 = dma.vmem_to_hbm [thread:$0]  %s716_s24, 512, %s986_s5, [#allocation4], %s815_s28, %s815_s28, %s816_s29  }
 0x1b1   :  { %812 = dma.done.wait [#allocation4], 512  }
 0x1b2   :  { %813 = vsyncadd [#allocation4], 4294966784 }
 0x1b3   :  { %725 = vsyncpa [#allocation3], 1 }
 0x1b4   :  { %726 = vsyncpa [#allocation4], 1 }

</bundles_post_ra>
